<compile_context>
chip_gen: v7x
topology: tpu7x:2x2x1
jax: 0.10.0
libtpu: 0.0.40
codegen_flags: <defaults>
</compile_context>

<pallas_src>
import jax
import jax.numpy as jnp
import numpy as np
from jax.experimental import pallas as pl
from jax.experimental.pallas import tpu as pltpu


def _round_up(x, m):
    return (x + m - 1) // m * m


def _resblock_kernel(cols_ref, w_ref, b_ref, out_ref):
    # cols_ref: (1, Kp, TP) bf16   w_ref: (2*Cop, Kp) bf16
    # b_ref   : (2*Cop, 1)  f32    out_ref: (1, Cop, TP) f32
    cop = out_ref.shape[1]
    cols = cols_ref[0]                                          # (Kp, TP) bf16
    # single fused MXU matmul for both transposed convs, f32 accumulation
    y = jnp.dot(w_ref[...], cols, preferred_element_type=jnp.float32)
    y = y + b_ref[...]                                          # one f32 bias add per tile
    y1 = y[:cop]                                                # conv1 rows
    y2 = y[cop:]                                                # conv_skip rows
    out_ref[0] = jnp.maximum(y1, 0.0) + y2                      # relu(conv1) + conv_skip


def _dilate_and_pad(x, stride, padding, output_padding, k):
    # input dilation + padding that turns ConvTranspose2d into a plain VALID conv
    N, C, H, W = x.shape
    Hd, Wd = (H - 1) * stride + 1, (W - 1) * stride + 1
    xd = jnp.zeros((N, C, Hd, Wd), x.dtype).at[:, :, ::stride, ::stride].set(x)
    lo = k - 1 - padding
    hi = k - 1 - padding + output_padding
    return jnp.pad(xd, ((0, 0), (0, 0), (lo, hi), (lo, hi)))


def _im2col(x_pd, k, Ho, Wo):
    N, C, _, _ = x_pd.shape
    patches = [x_pd[:, :, kh:kh + Ho, kw:kw + Wo]
               for kh in range(k) for kw in range(k)]
    cols = jnp.stack(patches, axis=2)                 # (N, C, k*k, Ho, Wo)
    return cols.reshape(N, C * k * k, Ho * Wo)        # (N, K, P)


def _pick_tile_p(P, Kp, Cop, vmem_budget_bytes=20 * 1024 * 1024):
    """Largest lane tile (multiple of 128) whose double-buffered cols(bf16)
    + out(f32) blocks fit the VMEM budget; safe across v5e/v6e/v7x."""
    bytes_per_lane = 2 * (Kp * 2 + Cop * 4)           # 2 buffers * (cols + out)
    max_tile = max(128, (vmem_budget_bytes // bytes_per_lane) // 128 * 128)
    tile = min(max_tile, 8192)
    p_pad128 = _round_up(P, 128)
    if p_pad128 <= tile:                              # whole P fits in one tile
        return p_pad128
    return tile


def res_block_conv_trans_skip(x, w1_t, b1, ws_t, bs, *, stride,
                              padding=0, output_padding=0):
    """Pallas ResBlockConvTransSkip forward (use_bn=False, use_1x1=False).

    x    : (N, C_in, H, W) float32, NCHW
    w*_t : (C_in, C_out, 3, 3)  PyTorch ConvTranspose2d weight layout
    b*   : (C_out,)
    """
    # TODO(synk): use_bn / use_1x1 branches not exercised (module defaults are False).
    k = 3
    N, C_in, H, W = x.shape
    C_out = w1_t.shape[1]
    Ho = (H - 1) * stride - 2 * padding + k + output_padding
    Wo = (W - 1) * stride - 2 * padding + k + output_padding

    # turn the transposed conv into a VALID conv on a dilated / padded input
    x_pd = _dilate_and_pad(x, stride, padding, output_padding, k)
    cols = _im2col(x_pd, k, Ho, Wo)                   # (N, K, P)
    K, P = C_in * k * k, Ho * Wo

    # conv-equivalent weight: W_conv[oc, ic, a, b] = W_t[ic, oc, k-1-a, k-1-b]
    def to_mat(w_t):
        w_conv = jnp.flip(jnp.transpose(w_t, (1, 0, 2, 3)), axis=(2, 3))
        return w_conv.reshape(C_out, K)

    Cop = _round_up(C_out, 8)          # full-sublane output stores
    Kp = _round_up(K, 16)              # bf16 sublane packing; keep cols HBM bytes low

    def pad_w(w_m):                    # (C_out, K) -> (Cop, Kp); zero padded rows/cols
        return jnp.pad(w_m, ((0, Cop - C_out), (0, Kp - K)))

    # fused weight: rows [0:Cop] = conv1, rows [Cop:2*Cop] = conv_skip
    w_f = jnp.concatenate([pad_w(to_mat(w1_t)), pad_w(to_mat(ws_t))],
                          axis=0).astype(jnp.bfloat16)                # (2*Cop, Kp)
    b_f = jnp.concatenate([jnp.pad(b1, (0, Cop - C_out)),
                           jnp.pad(bs, (0, Cop - C_out))]
                          ).reshape(2 * Cop, 1).astype(jnp.float32)   # (2*Cop, 1)

    TILE_P = _pick_tile_p(P, Kp, Cop)
    Pp = _round_up(P, TILE_P)
    n_pt = Pp // TILE_P

    cols_p = jnp.pad(cols, ((0, 0), (0, Kp - K), (0, Pp - P))
                     ).astype(jnp.bfloat16)                           # (N, Kp, Pp)

    out_p = pl.pallas_call(
        _resblock_kernel,
        out_shape=jax.ShapeDtypeStruct((N, Cop, Pp), jnp.float32),
        grid=(N, n_pt),
        in_specs=[
            pl.BlockSpec((1, Kp, TILE_P), lambda n, p: (n, 0, p)),
            pl.BlockSpec((2 * Cop, Kp), lambda n, p: (0, 0)),   # resident weights
            pl.BlockSpec((2 * Cop, 1), lambda n, p: (0, 0)),    # resident bias
        ],
        out_specs=pl.BlockSpec((1, Cop, TILE_P), lambda n, p: (n, 0, p)),
        compiler_params=pltpu.CompilerParams(
            dimension_semantics=("parallel", "parallel"),
            vmem_limit_bytes=32 * 1024 * 1024),
    )(cols_p, w_f, b_f)

    return out_p[:, :C_out, :P].reshape(N, C_out, Ho, Wo)


if __name__ == "__main__":
    N, C_in, C_out, H, W = 2, 4, 4, 16, 16
    stride, padding, output_padding = 2, 0, 0

    key = jax.random.PRNGKey(0)
    k1, k2, k3, k4, k5 = jax.random.split(key, 5)
    x = jax.random.normal(k1, (N, C_in, H, W), jnp.float32)

    # deterministic init mimicking PyTorch's uniform(-1/sqrt(fan), 1/sqrt(fan))
    bound = 1.0 / np.sqrt(C_in * 3 * 3)
    w1 = jax.random.uniform(k2, (C_in, C_out, 3, 3), jnp.float32, -bound, bound)
    b1 = jax.random.uniform(k3, (C_out,), jnp.float32, -bound, bound)
    ws = jax.random.uniform(k4, (C_in, C_out, 3, 3), jnp.float32, -bound, bound)
    bs = jax.random.uniform(k5, (C_out,), jnp.float32, -bound, bound)

    out = res_block_conv_trans_skip(
        x, w1, b1, ws, bs,
        stride=stride, padding=padding, output_padding=output_padding)
    out = jax.block_until_ready(out)

    # pure-JAX reference for the transposed convolution (PyTorch semantics)
    def ct_ref(xx, w_t, b):
        w_conv = jnp.flip(jnp.transpose(w_t, (1, 0, 2, 3)), axis=(2, 3))
        pad = (3 - 1 - padding, 3 - 1 - padding + output_padding)
        y = jax.lax.conv_general_dilated(
            xx, w_conv, window_strides=(1, 1), padding=[pad, pad],
            lhs_dilation=(stride, stride),
            dimension_numbers=("NCHW", "OIHW", "NCHW"))
        return y + b[None, :, None, None]

    ref = jnp.maximum(ct_ref(x, w1, b1), 0.0) + ct_ref(x, ws, bs)
    assert out.shape == ref.shape == (N, C_out, (H - 1) * stride + 3, (W - 1) * stride + 3)
    # bf16 matmul operands (f32 accumulation) -> loosened tolerance
    np.testing.assert_allclose(np.asarray(out), np.asarray(ref), rtol=2e-2, atol=2e-2)

    print("KERNEL_OK")
</pallas_src>

<mosaic_0001>
module attributes {stable_mosaic.version = 11 : i64} {
  func.func @_resblock_kernel(%arg0: i32, %arg1: i32, %arg2: memref<1x48x1152xbf16, #tpu.memory_space<vmem>>, %arg3: memref<16x48xbf16, #tpu.memory_space<vmem>>, %arg4: memref<16x1xf32, #tpu.memory_space<vmem>>, %arg5: memref<1x8x1152xf32, #tpu.memory_space<vmem>>) attributes {dimension_semantics = [#tpu.dimension_semantics<parallel>, #tpu.dimension_semantics<parallel>], iteration_bounds = array<i64: 2, 1>, scalar_prefetch = 0 : i64, scratch_operands = 0 : i64, tpu.core_type = #tpu.core_type<tc>, window_params = [{transform_indices = @transform_0, window_bounds = array<i64: 1, 48, 1152>}, {pipeline_mode = #tpu.pipeline_mode<synchronous>, transform_indices = @transform_1, window_bounds = array<i64: 16, 48>}, {pipeline_mode = #tpu.pipeline_mode<synchronous>, transform_indices = @transform_2, window_bounds = array<i64: 16, 1>}, {transform_indices = @transform_3, window_bounds = array<i64: 1, 8, 1152>}]} {
    %c0 = arith.constant 0 : index
    %c0_0 = arith.constant 0 : index
    %c0_1 = arith.constant 0 : index
    %0 = vector.load %arg2[%c0, %c0_0, %c0_1] : memref<1x48x1152xbf16, #tpu.memory_space<vmem>>, vector<1x48x1152xbf16>
    %1 = vector.shape_cast %0 : vector<1x48x1152xbf16> to vector<48x1152xbf16>
    %c0_2 = arith.constant 0 : index
    %c0_3 = arith.constant 0 : index
    %2 = vector.load %arg3[%c0_2, %c0_3] : memref<16x48xbf16, #tpu.memory_space<vmem>>, vector<16x48xbf16>
    %cst = arith.constant dense<0.000000e+00> : vector<16x1152xf32>
    %3 = tpu.matmul %2, %1, %cst {dimension_numbers = #tpu.dot_dimension_numbers<[1], [0], [0], [1], [0, 0, 1, 1], [], []>} : vector<16x48xbf16>, vector<48x1152xbf16>, vector<16x1152xf32> -> vector<16x1152xf32>
    %c0_4 = arith.constant 0 : index
    %c0_5 = arith.constant 0 : index
    %4 = vector.load %arg4[%c0_4, %c0_5] : memref<16x1xf32, #tpu.memory_space<vmem>>, vector<16x1xf32>
    %5 = vector.broadcast %4 : vector<16x1xf32> to vector<16x1152xf32>
    %6 = arith.addf %3, %5 : vector<16x1152xf32>
    %7 = vector.extract_strided_slice %6 {offsets = [0, 0], sizes = [8, 1152], strides = [1, 1]} : vector<16x1152xf32> to vector<8x1152xf32>
    %8 = vector.extract_strided_slice %6 {offsets = [8, 0], sizes = [8, 1152], strides = [1, 1]} : vector<16x1152xf32> to vector<8x1152xf32>
    %cst_6 = arith.constant 0.000000e+00 : f32
    %9 = vector.broadcast %cst_6 : f32 to vector<8x1152xf32>
    %10 = arith.maximumf %7, %9 : vector<8x1152xf32>
    %11 = arith.addf %10, %8 : vector<8x1152xf32>
    %c0_7 = arith.constant 0 : index
    %c0_8 = arith.constant 0 : index
    %c0_9 = arith.constant 0 : index
    %12 = vector.load %arg5[%c0_7, %c0_8, %c0_9] : memref<1x8x1152xf32, #tpu.memory_space<vmem>>, vector<1x8x1152xf32>
    %13 = vector.shape_cast %12 : vector<1x8x1152xf32> to vector<8x1152xf32>
    %14 = vector.shape_cast %11 : vector<8x1152xf32> to vector<1x8x1152xf32>
    tpu.vector_store %arg5[%c0_7, %c0_8, %c0_9], %14 {strides = array<i32>} : memref<1x8x1152xf32, #tpu.memory_space<vmem>>, vector<1x8x1152xf32>,
    return
  }
  func.func @transform_0(%arg0: i32, %arg1: i32) -> (i32, i32, i32) {
    %c0_i32 = arith.constant 0 : i32
    %c0_i32_0 = arith.constant 0 : i32
    return %arg0, %c0_i32, %arg1 : i32, i32, i32
  }
  func.func @transform_1(%arg0: i32, %arg1: i32) -> (i32, i32) {
    %c0_i32 = arith.constant 0 : i32
    %c0_i32_0 = arith.constant 0 : i32
    %c0_i32_1 = arith.constant 0 : i32
    return %c0_i32, %c0_i32_0 : i32, i32
  }
  func.func @transform_2(%arg0: i32, %arg1: i32) -> (i32, i32) {
    %c0_i32 = arith.constant 0 : i32
    %c0_i32_0 = arith.constant 0 : i32
    %c0_i32_1 = arith.constant 0 : i32
    return %c0_i32, %c0_i32_0 : i32, i32
  }
  func.func @transform_3(%arg0: i32, %arg1: i32) -> (i32, i32, i32) {
    %c0_i32 = arith.constant 0 : i32
    %c0_i32_0 = arith.constant 0 : i32
    return %arg0, %c0_i32, %arg1 : i32, i32, i32
  }
}

</mosaic_0001>

<bundles_post_ra>
// kernel: tpu_custom_call.1
= control target key start
LH: loop header
LB: loop body
LE: loop exit
PB: predicated region body
PF: predicated region fallthrough
CT: control target
= control target key end

     0   :  { %8 = vsyncpa [#allocation3], 0  ;;  %s1292_s0 = inlined_call_operand.hbm [shape: bf16[2,48,1152], index: 0, kind: input, shape index: {}]   ;;  %s1293_s1 = inlined_call_operand.vmem [shape: bf16[16,48], index: 1, kind: input, shape index: {}]   ;;  %s1294_s2 = inlined_call_operand.vmem [shape: f32[16,1], index: 2, kind: input, shape index: {}]   ;;  %s1295_s3 = inlined_call_operand.hbm [shape: f32[2,8,1152], index: 3, kind: output, shape index: {}]  }
   0x1   :  { %10 = vsyncpa [#allocation3 + $0x1], 0 }
   0x2   :  { %11 = vsyncpa [#allocation4], 0 }
   0x3   :  { %13 = vsyncpa [#allocation4 + $0x1], 0  ;;  %s1052_s12 = smov 0   ;;  %s1054_s13 = smov 0  }
   0x4   :  { %s1056_s14 = smov 0   ;;  %s1058_s15 = smov 0  }
   0x5   :  { %s1060_s16 = smov 0   ;;  %s1062_s17 = smov 0  }
   0x6 LB: > { %s742_s18 = sadd.s32 4294967295, %s1023_s17   ;;  %s743_s19 = sadd.s32 4294967294, %s1023_s17   ;;  %s1023_s17 = sphi %s1062_s17, %s19_s17   ;;  %s1019_s16 = sphi %s1060_s16, %s1310_s16   ;;  %s1015_s15 = sphi %s1058_s15, %s1309_s15   ;;  %s1011_s14 = sphi %s1056_s14, %s1308_s14   ;;  %s1007_s13 = sphi %s1054_s13, %s1307_s13   ;;  %s1003_s12 = sphi %s1052_s12, %s1306_s12  }
   0x7   : > { %s31_s20 = sadd.s32 1, %s1019_s16  ;;  %s40_s21 = sadd.s32 1, %s1011_s14 }
   0x8   : > { %p33_p0 = scmp.ge.s32.totalorder %s31_s20, 2  ;;  %p47_p1 = scmp.ne.s32.totalorder %s1011_s14, %s1007_s13 }
   0x9   : > { %p48_p2 = scmp.eq.s32.totalorder %s1023_s17, 0  ;;  %p53_p3 = scmp.ne.s32.totalorder %s1007_s13, %s1003_s12 }
   0xa   : > { %s1312_s20 = smov (%p33_p0, %s31_s20), 0  ;;  %p54_p5 = scmp.eq.s32.totalorder %s742_s18, 0 }
   0xb   : > { %p1093_p4 = por %p48_p2, %p47_p1  ;;  %s35_s23 = ssub.s32 %s1019_s16, %s1312_s20 }
   0xc   : > { %p121_p6 = scmp.eq.s32.totalorder %s742_s18, 1  ;;  %p38_p7 = scmp.eq.s32.totalorder %s35_s23, 0 }
   0xd   : > { %p1099_p8 = por %p54_p5, %p53_p3  ;;  %p127_p10 = scmp.eq.s32.totalorder %s743_s19, 1 }
   0xe   : > { %p1103_p9 = por %p121_p6, %p47_p1  ;;  %p815_p13 = scmp.lt.s32.totalorder %s1023_s17, 2 }
   0xf   : > { %s1108_s26 = scalar_select %p38_p7, %s1011_s14, %s40_s21  }
  0x10   : > { %s1299_s25 = scalar_select %p1103_p9, 1, 0 }
  0x11   : > { %p1110_p11 = por %p127_p10, %p53_p3  ;;  %s153_s28 = sand.u32 1, %s1011_s14  }
  0x12   : > { %s798_s29 = smul.u32 216, %s153_s28  ;;  %p1120_p0 = pnand %p815_p13, %p1093_p4 }
  0x13   : > { %s1300_s27 = scalar_select %p1110_p11, 1, 0 }
  0x14   : > { %s799_s30 = smul.u32 3456, %s1019_s16  ;;  %s157_s8 = scalar_lea.vmem [#allocation2], %s798_s29 }
  0x15   : > { %s166_s9 = sshll.u32 %s157_s8, 4  ;;  %s1132_s10 = scalar_lea.sflag [#allocation3], %s153_s28  ;;  %s1129_s9 = int_to_ptr.vmem [resolvable:$true] %s166_s9 }
  0x16   : > { %s1127_s7 = scalar_lea.hbm %s1292_s0, %s799_s30  ;;  %p913_p3 = pneg %p1120_p0 }
  0x17   : > { %s911_s11 = scalar_lea.hbm %s1127_s7, 3456  ;;  %s916_s21 = scalar_lea.hbm %s1292_s0, 6912 }
  0x18   : > { %p912_p2 = scmp.ne.s32.totalorder %s1127_s7, %s911_s11  ;;  %p917_p6 = scmp.lt.u32.totalorder %s1127_s7, %s1292_s0 }
  0x19   : > { %p918_p7 = scmp.lt.u32.totalorder %s916_s21, %s911_s11  ;;  %p920_p13 = scmp.lt.u32.totalorder %s911_s11, %s1127_s7 }
  0x1a   : > { %p914_p4 = pnand %p913_p3, %p912_p2 }
  0x1b   : > { %p919_p10 = por %p918_p7, %p917_p6 }
  0x1c   : > { %p915_p5 = pneg %p914_p4 }
  0x1d   : > { %p921_p12 = por %p920_p13, %p919_p10 }
  0x1f   : > { %p922_p1 = pnand %p921_p12, %p915_p5 }
  0x21   : > { %925 = shalt.err (!%p922_p1)
}
  0x22   : > { %s926_s28 = scalar_lea.vmem %s1129_s9, 3456  ;;  %s1025_s29 = smov [#allocation2]  }
  0x23   : > { %p927_p2 = scmp.ne.s32.totalorder %s1129_s9, %s926_s28  ;;  %s931_s30 = sshll.u32 %s1025_s29, 4  ;;  %s932_s30 = int_to_ptr.vmem [resolvable:$false] %s931_s30 }
  0x24   : > { %s933_s5 = scalar_lea.vmem %s932_s30, 6912  ;;  %p934_p9 = scmp.lt.s32.totalorder %s1129_s9, %s932_s30 }
  0x25   : > { %p929_p4 = pnand %p927_p2, %p913_p3  ;;  %p935_p6 = scmp.lt.s32.totalorder %s933_s5, %s926_s28 }
  0x27   : > { %p930_p11 = pneg %p929_p4  ;;  %p936_p7 = por %p935_p6, %p934_p9 }
  0x29   : > { %p937_p10 = pnand %p936_p7, %p930_p11 }
  0x2b   : > { %940 = shalt.err (!%p937_p10)
}
  0x2c   : > { %s1026_s6 = smov 576   ;;  %s1027_s8 = smov 36  }
  0x2d   : > { %810 = dma.hbm_to_vmem [thread:$0]  (!%p1120_p0), %s1127_s7, 3456, %s1129_s9, %s1132_s10, %s1026_s6, %s1026_s6, %s1027_s8  }
  0x2e   : > { %p174_p12 = scmp.lt.s32.totalorder %s1023_s17, 3  ;;  %p1302_p1 = scmp.ge.s32.totalorder %s1023_s17, 1 }
  0x30   : > { %p175_p3 = pnand %p1302_p1, %p174_p12 }
  0x31   : > { %s1164_s11 = sand.u32 (!%p175_p3), 1, %s1007_s13  }
  0x32   : > { %178 = sbr.rel (%p175_p3) target bundleno = 328 (0x148), region = 32  ;;  %s181_s19 = scalar_lea.sflag (!%p175_p3), [#allocation3], %s1164_s11 }
  0x33   : > { %s800_s18 = smul.u32 (!%p175_p3), 216, %s1164_s11 }
  0x35   : > { %s1168_s21 = scalar_lea.vmem (!%p175_p3), [#allocation2], %s800_s18 }
  0x39   : > { %994 = dma.done.wait (%p1099_p8), %s181_s19, 3456  }
  0x3a   : > { %996 = vsyncadd (%p1099_p8), %s181_s19, 4294963840  ;;  %v1028_v0 = vmov 0   ;;  %v871_v1 = vld [vmem:[%s1168_s21 + $0x4] ss:$36 sps:$4 sm:$0xff]   ;;  %v874_v3 = vld [vmem:[%s1168_s21 + $0x4c] ss:$36 sps:$4 sm:$0xff]  }
  0x3b   : > { %433 = vmatprep.mubr.bf16.mxu0 %v1028_v0  ;;  %476 = vmatprep.mubr.bf16.mxu1 %v1028_v0  ;;  %v873_v2 = vld [vmem:[%s1168_s21] ss:$36 sps:$4 sm:$0xff]   ;;  %v876_v4 = vld [vmem:[%s1168_s21 + $0x48] ss:$36 sps:$4 sm:$0xff]   ;;  %v879_v6 = vld [vmem:[%s1168_s21 + $0x94] ss:$36 sps:$4 sm:$0xff]  }
  0x3c   : > { %870 = vset.pattern.permute.xlu0 %v1028_v0  ;;  %401 = vmatprep.subr.bf16.mxu0 %v871_v1  ;;  %v877_v5 = vld [vmem:[%s1168_s21 + $0xc] ss:$36 sps:$4 sm:$0xff]   ;;  %v883_v8 = vld [vmem:[%s1168_s21 + $0x54] ss:$36 sps:$4 sm:$0xff]   ;;  %v890_v13 = vld [vmem:[%s1168_s21 + $0x9c] ss:$36 sps:$4 sm:$0xff]  }
  0x3d   : > { %402 = vmatpush1.bf16.msra.mxu0 %v873_v2  ;;  %v881_v7 = vld [vmem:[%s1168_s21 + $0x8] ss:$36 sps:$4 sm:$0xff]   ;;  %444 = vmatprep.subr.bf16.mxu1 %v877_v5  ;;  %v882_v9 = vld [vmem:[%s1168_s21 + $0x90] ss:$36 sps:$4 sm:$0xff]   ;;  %v892_v14 = vld [vmem:[%s1168_s21 + $0x98] ss:$36 sps:$4 sm:$0xff]  }
  0x3e   : > { %403 = vmatprep.subr.bf16.mxu0 %v874_v3  ;;  %445 = vmatpush1.bf16.msra.mxu1 %v881_v7  ;;  %v886_v10 = vld [vmem:[%s1168_s21 + $0x50] ss:$36 sps:$4 sm:$0xff]   ;;  %v885_v11 = vld [vmem:[%s1293_s1] sm:$0xff]   ;;  %vm397_vm0 = vcmask 392192   ;;  %v896_v18 = vld [vmem:[%s1168_s21 + $0x18] ss:$36 sps:$4 sm:$0xff]  }
  0x3f   : > { %446 = vmatprep.subr.bf16.mxu1 %v883_v8  ;;  %v889_v12 = vld [vmem:[%s1168_s21 + $0x14] ss:$36 sps:$4 sm:$0xff]   ;;  %v895_v16 = vld [vmem:[%s1168_s21 + $0x5c] ss:$36 sps:$4 sm:$0xff]   ;;  %v904_v20 = vld [vmem:[%s1168_s21 + $0x64] ss:$36 sps:$4 sm:$0xff]  }
  0x40   : > { %v887_v15 = vld [vmem:[%s1168_s21 + $0x10] ss:$36 sps:$4 sm:$0xff]   ;;  %v898_v17 = vld [vmem:[%s1168_s21 + $0x1c] ss:$36 sps:$4 sm:$0xff]   ;;  %v901_v21 = vld [vmem:[%s1168_s21 + $0xa4] ss:$36 sps:$4 sm:$0xff]  }
  0x41   : > { %404 = vmatpush1.bf16.msra.mxu0 %v876_v4  ;;  %v893_v19 = vld [vmem:[%s1168_s21 + $0x58] ss:$36 sps:$4 sm:$0xff]   ;;  %v899_v22 = vld [vmem:[%s1168_s21 + $0xa0] ss:$36 sps:$4 sm:$0xff]   ;;  %v908_v24 = vld [vmem:[%s1168_s21 + $0xac] ss:$36 sps:$4 sm:$0xff]  }
  0x42   : > { %405 = vmatprep.subr.bf16.mxu0 %v879_v6  ;;  %447 = vmatpush1.bf16.msra.mxu1 %v886_v10  ;;  %v902_v23 = vld [vmem:[%s1168_s21 + $0x60] ss:$36 sps:$4 sm:$0xff]   ;;  %v906_v26 = vld [vmem:[%s1168_s21 + $0xa8] ss:$36 sps:$4 sm:$0xff]   ;;  %v1029_v29 = vmov 0.0   ;;  %vm1030_vm1 = vmmov 0  }
  0x43   : > { %448 = vmatprep.subr.bf16.mxu1 %v890_v13  ;;  %v242_v25 = vld [vmem:[%s1294_s2] sm:$0xff]  ;;  %v243_v27 = vld [vmem:[%s1294_s2 + $0x8] sm:$0xff]  ;;  %s801_s23 = smul.u32 72, %s1164_s11  ;;  %s642_s18 = scalar_lea.sflag [#allocation4], %s1164_s11 }
  0x44   : > { %246 = vperm.xlu0 %870, %v242_v25   ;;  %v905_v28 = vld [vmem:[%s1168_s21 + $0x20] ss:$36 sps:$4 sm:$0xff]   ;;  %v909_v30 = vld [vmem:[%s1168_s21 + $0x68] ss:$36 sps:$4 sm:$0xff]   ;;  %v910_v31 = vld [vmem:[%s1168_s21 + $0xb0] ss:$36 sps:$4 sm:$0xff]  }
  0x45   : > { %406 = vmatpush1.bf16.msra.mxu0 %v882_v9  ;;  %s1221_s28 = scalar_lea.vmem [#allocation5], %s801_s23  ;;  %s802_s29 = smul.u32 1152, %s1015_s15 }
  0x46   : > { %487 = vmatprep.subr.bf16.mxu0 %v889_v12  ;;  %449 = vmatpush1.bf16.msra.mxu1 %v892_v14  ;;  %s658_s30 = sshll.u32 %s1221_s28, 4  ;;  %p1303_p9 = scmp.ne.s32.totalorder %s1299_s25, 0  ;;  %s1244_s30 = int_to_ptr.vmem [resolvable:$true] %s658_s30 }
  0x47   : > { %530 = vmatprep.subr.bf16.mxu1 %v898_v17  ;;  %s1242_s8 = scalar_lea.hbm %s1295_s3, %s802_s29  ;;  %s941_s15 = scalar_lea.vmem %s1244_s30, 1152 }
  0x48   : > { %776 = vmatmul.mubr.msk.bf16.vlgmr.msra.gmra.mrb[0].mxu0 %vm397_vm0, %v885_v11  ;;  %251 = vperm.xlu0 %870, %v243_v27   ;;  %p942_p8 = scmp.ne.s32.totalorder %s1244_s30, %s941_s15  ;;  %s1031_s19 = smov [#allocation5]  }
  0x49   : > { %488 = vmatpush1.bf16.msra.mxu0 %v887_v15  ;;  %519 = vmatprep.mubr.bf16.mxu0 %v1028_v0  ;;  %s945_s21 = sshll.u32 %s1031_s19, 4  ;;  %s946_s21 = int_to_ptr.vmem [resolvable:$false] %s945_s21 }
  0x4a   : > { %489 = vmatprep.subr.bf16.mxu0 %v895_v16  ;;  %777 = vmatmul.mubr.msk.bf16.vlgmr.msra.gmra.mrb[0].mxu1 %vm397_vm0, %v885_v11  ;;  %p943_p11 = pnand %p942_p8, %p1303_p9  ;;  %s947_s24 = scalar_lea.vmem %s946_s21, 2304 }
  0x4b   : > { %531 = vmatpush1.bf16.msra.mxu1 %v896_v18  ;;  %562 = vmatprep.mubr.bf16.mxu1 %v1028_v0  ;;  %p948_p5 = scmp.lt.s32.totalorder %s1244_s30, %s946_s21  ;;  %p949_p13 = scmp.lt.s32.totalorder %s947_s24, %s941_s15 }
  0x4c   : > { %532 = vmatprep.subr.bf16.mxu1 %v904_v20  ;;  %p944_p0 = pneg %p943_p11 }
  0x4d   : > { %490 = vmatpush1.bf16.msra.mxu0 %v893_v19  ;;  %p950_p2 = por %p949_p13, %p948_p5 }
  0x4e   : > { %491 = vmatprep.subr.bf16.mxu0 %v901_v21 }
  0x4f   : > { %533 = vmatpush1.bf16.msra.mxu1 %v902_v23  ;;  %p951_p4 = pnand %p950_p2, %p944_p0 }
  0x50   : > { %534 = vmatprep.subr.bf16.mxu1 %v908_v24 }
  0x51   : > { %492 = vmatpush1.bf16.msra.mxu0 %v899_v22 }
  0x52   : > { %788 = vmatprep.subr.bf16.mxu0 %v1029_v29 }
  0x53   : > { %535 = vmatpush1.bf16.msra.mxu1 %v906_v26 }
  0x54   : > { %778 = vmatmul.mubr.msk.bf16.vlgmr.msra.gmra.mrb[4].mxu0 %vm397_vm0, %v885_v11 }
  0x55   : > { %789 = vmatpush3.bf16.msra.mxu0 %v905_v28  ;;  %794 = vmatprep.mubr.msk.bf16.mxu0 %vm1030_vm1, %v1029_v29 }
  0x56   : > { %790 = vmatprep.subr.bf16.mxu0 %v1029_v29  ;;  %779 = vmatmul.mubr.msk.bf16.vlgmr.msra.gmra.mrb[4].mxu1 %vm397_vm0, %v885_v11 }
  0x59   : > { %791 = vmatpush3.bf16.msra.mxu0 %v909_v30 }
  0x5a   : > { %792 = vmatprep.subr.bf16.mxu0 %v1029_v29 }
  0x5d   : > { %793 = vmatpush3.bf16.msra.mxu0 %v910_v31 }
  0x60   : > { %795 = vmatmul.mubr.msk.bf16.vlgmr.msra.gmra.mrb[8].mxu0 %vm397_vm0, %v885_v11 }
  0xc3   : > { %v247_v32 = vpop.permute.xlu0 %246 }
  0xc7   : > { %v1215_v34 = vpop.permute.xlu0 %251 }
 0x11b   : > { %v435_v33 = vpop.f32.mrb[0].mxu0 }
 0x11c   : > { %v436_v35 = vadd.f32 %v435_v33, %v247_v32  ;;  %v437_v36 = vpop.f32.mrb[1].mxu0 }
 0x11d   : > { %v438_v37 = vadd.f32 %v437_v36, %v247_v32  ;;  %v439_v38 = vpop.f32.mrb[2].mxu0  ;;  %v478_v42 = vpop.f32.mrb[0].mxu1 }
 0x11e   : > { %v614_v39 = vmax.f32 %v436_v35, 0.0  ;;  %v440_v40 = vadd.f32 %v439_v38, %v1215_v34  ;;  %v441_v41 = vpop.f32.mrb[3].mxu0  ;;  %v479_v45 = vadd.f32 %v478_v42, %v247_v32  ;;  %v480_v46 = vpop.f32.mrb[1].mxu1 }
 0x11f   : > { %v615_v43 = vmax.f32 %v438_v37, 0.0  ;;  %v442_v44 = vadd.f32 %v441_v41, %v1215_v34  ;;  %v481_v48 = vadd.f32 %v480_v46, %v247_v32  ;;  %v482_v49 = vpop.f32.mrb[2].mxu1 }
 0x120   : > { %v623_v47 = vadd.f32 %v614_v39, %v440_v40  ;;  %v616_v51 = vmax.f32 %v479_v45, 0.0  ;;  %v483_v52 = vadd.f32 %v482_v49, %v1215_v34  ;;  %v484_v53 = vpop.f32.mrb[3].mxu1 }
 0x121   : > { %v624_v50 = vadd.f32 %v615_v43, %v442_v44  ;;  %v617_v54 = vmax.f32 %v481_v48, 0.0  ;;  %v485_v55 = vadd.f32 %v484_v53, %v1215_v34 }
 0x122   : > { %632 = vst [vmem:[%s1221_s28] sm:$0xff] %v623_v47  ;;  %v625_v56 = vadd.f32 %v616_v51, %v483_v52 }
 0x123   : > { %633 = vst [vmem:[%s1221_s28 + $0x8] sm:$0xff] %v624_v50  ;;  %v626_v57 = vadd.f32 %v617_v54, %v485_v55 }
 0x124   : > { %634 = vst [vmem:[%s1221_s28 + $0x10] sm:$0xff] %v625_v56 }
 0x125   : > { %635 = vst [vmem:[%s1221_s28 + $0x18] sm:$0xff] %v626_v57 }
 0x127   : > { %v521_v58 = vpop.f32.mrb[4].mxu0 }
 0x128   : > { %v522_v59 = vadd.f32 %v521_v58, %v247_v32  ;;  %v523_v60 = vpop.f32.mrb[5].mxu0 }
 0x129   : > { %v524_v61 = vadd.f32 %v523_v60, %v247_v32  ;;  %v525_v62 = vpop.f32.mrb[6].mxu0  ;;  %v564_v2 = vpop.f32.mrb[4].mxu1 }
 0x12a   : > { %v618_v63 = vmax.f32 %v522_v59, 0.0  ;;  %v526_v0 = vadd.f32 %v525_v62, %v1215_v34  ;;  %v527_v1 = vpop.f32.mrb[7].mxu0  ;;  %v565_v5 = vadd.f32 %v564_v2, %v247_v32  ;;  %v566_v6 = vpop.f32.mrb[5].mxu1 }
 0x12b   : > { %v619_v3 = vmax.f32 %v524_v61, 0.0  ;;  %v528_v4 = vadd.f32 %v527_v1, %v1215_v34  ;;  %v567_v8 = vadd.f32 %v566_v6, %v247_v32  ;;  %v568_v9 = vpop.f32.mrb[6].mxu1 }
 0x12c   : > { %v627_v7 = vadd.f32 %v618_v63, %v526_v0  ;;  %v620_v11 = vmax.f32 %v565_v5, 0.0  ;;  %v569_v12 = vadd.f32 %v568_v9, %v1215_v34  ;;  %v570_v13 = vpop.f32.mrb[7].mxu1 }
 0x12d   : > { %v628_v10 = vadd.f32 %v619_v3, %v528_v4  ;;  %v621_v14 = vmax.f32 %v567_v8, 0.0  ;;  %v571_v15 = vadd.f32 %v570_v13, %v1215_v34 }
 0x12e   : > { %636 = vst [vmem:[%s1221_s28 + $0x20] sm:$0xff] %v627_v7  ;;  %v629_v16 = vadd.f32 %v620_v11, %v569_v12 }
 0x12f   : > { %637 = vst [vmem:[%s1221_s28 + $0x28] sm:$0xff] %v628_v10  ;;  %v630_v17 = vadd.f32 %v621_v14, %v571_v15 }
 0x130   : > { %638 = vst [vmem:[%s1221_s28 + $0x30] sm:$0xff] %v629_v16 }
 0x131   : > { %639 = vst [vmem:[%s1221_s28 + $0x38] sm:$0xff] %v630_v17 }
 0x133   : > { %v607_v18 = vpop.f32.mrb[8].mxu0 }
 0x134   : > { %v608_v19 = vadd.f32 %v607_v18, %v247_v32  ;;  %v796_v20 = vpop.f32.mrb[9].mxu0 }
 0x135   : > { %v610_v21 = vpop.f32.mrb[10].mxu0 }
 0x136   : > { %v622_v22 = vmax.f32 %v608_v19, 0.0  ;;  %v611_v23 = vadd.f32 %v610_v21, %v1215_v34  ;;  %v797_v24 = vpop.f32.mrb[11].mxu0 }
 0x138   : > { %v631_v25 = vadd.f32 %v622_v22, %v611_v23 }
 0x13a   : > { %640 = vst [vmem:[%s1221_s28 + $0x40] sm:$0xff] %v631_v25 }
 0x13b   : > { %954 = shalt.err (!%p951_p4)
}
 0x13c   : > { %s955_s11 = scalar_lea.hbm %s1242_s8, 1152  ;;  %s959_s9 = scalar_lea.hbm %s1295_s3, 2304 }
 0x13d   : > { %p956_p6 = scmp.ne.s32.totalorder %s1242_s8, %s955_s11  ;;  %p960_p12 = scmp.lt.u32.totalorder %s1242_s8, %s1295_s3 }
 0x13e   : > { %p961_p1 = scmp.lt.u32.totalorder %s959_s9, %s955_s11  ;;  %p963_p8 = scmp.lt.u32.totalorder %s955_s11, %s1242_s8 }
 0x13f   : > { %p957_p7 = pnand %p956_p6, %p1303_p9 }
 0x140   : > { %p962_p3 = por %p961_p1, %p960_p12 }
 0x141   : > { %p958_p10 = pneg %p957_p7 }
 0x142   : > { %p964_p11 = por %p963_p8, %p962_p3 }
 0x144   : > { %p965_p0 = pnand %p964_p11, %p958_p10 }
 0x146   : > { %968 = shalt.err (!%p965_p0)
}
 0x147   : > { %805 = dma.vmem_to_hbm [thread:$0]  (%p1303_p9), %s1244_s30, 1152, %s1242_s8, %s642_s18  }
 0x148 PF: > { %s670_s23 = sand.u32 1, %s1003_s12   ;;  %p1304_p5 = scmp.ne.s32.totalorder %s1300_s27, 0 }
 0x149   : > { %p1305_p13 = scmp.ge.s32.totalorder %s1023_s17, 2  ;;  %s671_s28 = scalar_lea.sflag [#allocation4], %s670_s23 }
 0x14b   : > { %p812_p2 = pnand %p1305_p13, %p1304_p5 }
 0x14d   : > { %998 = dma.done.wait (!%p812_p2), %s671_s28, 1152  }
 0x14e   : > { %1000 = vsyncadd (!%p812_p2), %s671_s28, 4294966144  ;;  %s19_s17 = sadd.s32 1, %s1023_s17   ;;  %s1306_s12 = smov %s1007_s13 }
 0x14f   : > { %p16_p4 = scmp.ge.s32.totalorder %s19_s17, 4   ;;  %s1307_s13 = smov %s1011_s14 }
 0x150   : > { %s1308_s14 = smov %s1108_s26  ;;  %s1309_s15 = smov %s1019_s16 }
 0x151   : > { %s1310_s16 = smov %s1312_s20  ;;  %18 = sbr.rel (!%p16_p4) target bundleno = 6 (0x6), region = 77 }
 0x158   :  { %676 = vsyncpa [#allocation3], 1 }
 0x159   :  { %678 = vsyncpa [#allocation3 + $0x1], 1 }
 0x15a   :  { %679 = vsyncpa [#allocation4], 1 }
 0x15b   :  { %681 = vsyncpa [#allocation4 + $0x1], 1 }

</bundles_post_ra>
